<compile_context>
chip_gen: v7x
topology: tpu7x:2x2x1
jax: 0.10.0
libtpu: 0.0.40
codegen_flags: <defaults>
</compile_context>

<pallas_src>
import jax
import jax.numpy as jnp
from jax import lax
from jax.experimental import pallas as pl
from jax.experimental.pallas import tpu as pltpu

IN_F, HID_F = 60, 180          # logical (PyTorch) feature sizes
IN_PAD, HID_PAD = 64, 256      # zero-padded sizes used inside the kernel


def _round_up(n, m):
    return ((n + m - 1) // m) * m


def wide_kernel(x_ref, w1_ref, b1_ref, w2_ref, b2_ref, o_ref):
    # hidden = relu(x @ W1 + b1)           -- bf16 MXU matmul, f32 accumulate
    h = jnp.dot(x_ref[...], w1_ref[...], preferred_element_type=jnp.float32)
    h = jnp.maximum(h + b1_ref[...], 0.0)                 # f32 (TILE_B, 256)

    # out = sigmoid(w2 . h + b2) with batch on the LANE axis -> (1, TILE_B)
    z = lax.dot_general(w2_ref[...], h,
                        dimension_numbers=(((1,), (1,)), ((), ())),
                        preferred_element_type=jnp.float32)
    z = z + b2_ref[...]                                   # (1, TILE_B) + (1, 1)
    o_ref[...] = jax.nn.sigmoid(z).astype(o_ref.dtype)


def wide_forward(x, w1, b1, w2, b2, *, tile_b=512):
    """x: (B, 60) f32. w1: (60, 180), b1: (180,), w2: (180, 1), b2: (1,)."""
    B = x.shape[0]
    tile_b = min(tile_b, _round_up(B, 8))       # small-batch: single tile
    b_pad = _round_up(B, tile_b)
    grid = (b_pad // tile_b,)

    # --- pad once in the wrapper; bf16 for the HBM-dominant streams -------
    xp = jnp.zeros((b_pad, IN_PAD), jnp.bfloat16)
    xp = xp.at[:B, :IN_F].set(x.astype(jnp.bfloat16))
    w1p = jnp.zeros((IN_PAD, HID_PAD), jnp.bfloat16)
    w1p = w1p.at[:IN_F, :HID_F].set(w1.astype(jnp.bfloat16))
    b1p = jnp.zeros((1, HID_PAD), jnp.float32).at[:, :HID_F].set(
        b1.reshape(1, HID_F).astype(jnp.float32))
    w2p = jnp.zeros((1, HID_PAD), jnp.float32).at[:, :HID_F].set(
        w2.reshape(1, HID_F).astype(jnp.float32))   # (180,1) -> row vector
    b2p = b2.reshape(1, 1).astype(jnp.float32)

    out = pl.pallas_call(
        wide_kernel,
        out_shape=jax.ShapeDtypeStruct((1, b_pad), jnp.float32),
        grid=grid,
        in_specs=[
            pl.BlockSpec((tile_b, IN_PAD), lambda i: (i, 0)),    # x: tiled on batch
            pl.BlockSpec((IN_PAD, HID_PAD), lambda i: (0, 0)),   # W1: VMEM-resident
            pl.BlockSpec((1, HID_PAD), lambda i: (0, 0)),        # b1
            pl.BlockSpec((1, HID_PAD), lambda i: (0, 0)),        # w2 row
            pl.BlockSpec((1, 1), lambda i: (0, 0)),              # b2
        ],
        out_specs=pl.BlockSpec((1, tile_b), lambda i: (0, i)),   # lane-dense output
        compiler_params=pltpu.CompilerParams(
            dimension_semantics=("parallel",)),
    )(xp, w1p, b1p, w2p, b2p)

    return out[0, :B].reshape(B, 1)


def init_params(key):
    # Roughly matches PyTorch default Linear init U(-1/sqrt(fan_in), +).
    k1, k2, k3, k4 = jax.random.split(key, 4)
    bound1 = 1.0 / jnp.sqrt(60.0)
    bound2 = 1.0 / jnp.sqrt(180.0)
    w1 = jax.random.uniform(k1, (IN_F, HID_F), jnp.float32, -bound1, bound1)
    b1 = jax.random.uniform(k2, (HID_F,), jnp.float32, -bound1, bound1)
    w2 = jax.random.uniform(k3, (HID_F, 1), jnp.float32, -bound2, bound2)
    b2 = jax.random.uniform(k4, (1,), jnp.float32, -bound2, bound2)
    return w1, b1, w2, b2


def _reference(x, w1, b1, w2, b2):
    # Reference with the same bf16 rounding on x/W1 that the kernel applies
    # (f32 accumulation / activations everywhere else).
    xb = x.astype(jnp.bfloat16).astype(jnp.float32)
    w1b = w1.astype(jnp.bfloat16).astype(jnp.float32)
    h = jnp.maximum(xb @ w1b + b1.reshape(1, -1), 0.0)
    return jax.nn.sigmoid(h @ w2 + b2.reshape(1, 1))


if __name__ == "__main__":
    key = jax.random.PRNGKey(0)
    kx, kx2, kp = jax.random.split(key, 3)
    w1, b1, w2, b2 = init_params(kp)

    # Small-batch check (single tile).
    B = 8
    x = jax.random.normal(kx, (B, IN_F), jnp.float32)
    out = wide_forward(x, w1, b1, w2, b2)
    jax.block_until_ready(out)
    assert out.shape == (B, 1)
    assert jnp.allclose(out, _reference(x, w1, b1, w2, b2), atol=1e-4, rtol=1e-4)

    # Multi-tile + ragged-batch check (grid of 3 tiles of 512, B not a multiple).
    B2 = 1030
    x2 = jax.random.normal(kx2, (B2, IN_F), jnp.float32)
    out2 = wide_forward(x2, w1, b1, w2, b2)
    jax.block_until_ready(out2)
    assert out2.shape == (B2, 1)
    assert jnp.allclose(out2, _reference(x2, w1, b1, w2, b2), atol=1e-4, rtol=1e-4)

    print("KERNEL_OK")
</pallas_src>

<mosaic_0001>
module attributes {stable_mosaic.version = 11 : i64} {
  func.func @wide_kernel(%arg0: i32, %arg1: memref<8x64xbf16, #tpu.memory_space<vmem>>, %arg2: memref<64x256xbf16, #tpu.memory_space<vmem>>, %arg3: memref<1x256xf32, #tpu.memory_space<vmem>>, %arg4: memref<1x256xf32, #tpu.memory_space<vmem>>, %arg5: memref<1x1xf32, #tpu.memory_space<vmem>>, %arg6: memref<1x8xf32, #tpu.memory_space<vmem>>) attributes {dimension_semantics = [#tpu.dimension_semantics<parallel>], iteration_bounds = array<i64: 1>, scalar_prefetch = 0 : i64, scratch_operands = 0 : i64, tpu.core_type = #tpu.core_type<tc>, window_params = [{transform_indices = @transform_0, window_bounds = array<i64: 8, 64>}, {pipeline_mode = #tpu.pipeline_mode<synchronous>, transform_indices = @transform_1, window_bounds = array<i64: 64, 256>}, {pipeline_mode = #tpu.pipeline_mode<synchronous>, transform_indices = @transform_2, window_bounds = array<i64: 1, 256>}, {pipeline_mode = #tpu.pipeline_mode<synchronous>, transform_indices = @transform_3, window_bounds = array<i64: 1, 256>}, {pipeline_mode = #tpu.pipeline_mode<synchronous>, transform_indices = @transform_4, window_bounds = array<i64: 1, 1>}, {transform_indices = @transform_5, window_bounds = array<i64: 1, 8>}]} {
    %c0 = arith.constant 0 : index
    %c0_0 = arith.constant 0 : index
    %0 = vector.load %arg1[%c0, %c0_0] : memref<8x64xbf16, #tpu.memory_space<vmem>>, vector<8x64xbf16>
    %c0_1 = arith.constant 0 : index
    %c0_2 = arith.constant 0 : index
    %1 = vector.load %arg2[%c0_1, %c0_2] : memref<64x256xbf16, #tpu.memory_space<vmem>>, vector<64x256xbf16>
    %cst = arith.constant dense<0.000000e+00> : vector<8x256xf32>
    %2 = tpu.matmul %0, %1, %cst {dimension_numbers = #tpu.dot_dimension_numbers<[1], [0], [0], [1], [0, 0, 1, 1], [], []>} : vector<8x64xbf16>, vector<64x256xbf16>, vector<8x256xf32> -> vector<8x256xf32>
    %c0_3 = arith.constant 0 : index
    %c0_4 = arith.constant 0 : index
    %3 = vector.load %arg3[%c0_3, %c0_4] : memref<1x256xf32, #tpu.memory_space<vmem>>, vector<1x256xf32>
    %4 = vector.broadcast %3 : vector<1x256xf32> to vector<8x256xf32>
    %5 = arith.addf %2, %4 : vector<8x256xf32>
    %cst_5 = arith.constant 0.000000e+00 : f32
    %6 = vector.broadcast %cst_5 : f32 to vector<8x256xf32>
    %7 = arith.maximumf %5, %6 : vector<8x256xf32>
    %c0_6 = arith.constant 0 : index
    %c0_7 = arith.constant 0 : index
    %8 = vector.load %arg4[%c0_6, %c0_7] : memref<1x256xf32, #tpu.memory_space<vmem>>, vector<1x256xf32>
    %cst_8 = arith.constant dense<0.000000e+00> : vector<1x8xf32>
    %9 = tpu.matmul %8, %7, %cst_8 {dimension_numbers = #tpu.dot_dimension_numbers<[1], [1], [0], [0], [0, 0, 1, 0], [], []>} : vector<1x256xf32>, vector<8x256xf32>, vector<1x8xf32> -> vector<1x8xf32>
    %c0_9 = arith.constant 0 : index
    %c0_10 = arith.constant 0 : index
    %10 = vector.load %arg5[%c0_9, %c0_10] : memref<1x1xf32, #tpu.memory_space<vmem>>, vector<1x1xf32>
    %11 = vector.broadcast %10 : vector<1x1xf32> to vector<1x8xf32>
    %12 = arith.addf %9, %11 : vector<1x8xf32>
    %13 = arith.negf %12 : vector<1x8xf32>
    %14 = math.exp %13 : vector<1x8xf32>
    %cst_11 = arith.constant 1.000000e+00 : f32
    %15 = vector.broadcast %cst_11 : f32 to vector<1x8xf32>
    %16 = arith.addf %15, %14 : vector<1x8xf32>
    %17 = arith.divf %15, %16 : vector<1x8xf32>
    %c0_12 = arith.constant 0 : index
    %c0_13 = arith.constant 0 : index
    %18 = vector.load %arg6[%c0_12, %c0_13] : memref<1x8xf32, #tpu.memory_space<vmem>>, vector<1x8xf32>
    tpu.vector_store %arg6[%c0_12, %c0_13], %17 {strides = array<i32>} : memref<1x8xf32, #tpu.memory_space<vmem>>, vector<1x8xf32>,
    return
  }
  func.func @transform_0(%arg0: i32) -> (i32, i32) {
    %c0_i32 = arith.constant 0 : i32
    %c0_i32_0 = arith.constant 0 : i32
    return %arg0, %c0_i32 : i32, i32
  }
  func.func @transform_1(%arg0: i32) -> (i32, i32) {
    %c0_i32 = arith.constant 0 : i32
    %c0_i32_0 = arith.constant 0 : i32
    %c0_i32_1 = arith.constant 0 : i32
    return %c0_i32, %c0_i32_0 : i32, i32
  }
  func.func @transform_2(%arg0: i32) -> (i32, i32) {
    %c0_i32 = arith.constant 0 : i32
    %c0_i32_0 = arith.constant 0 : i32
    %c0_i32_1 = arith.constant 0 : i32
    return %c0_i32, %c0_i32_0 : i32, i32
  }
  func.func @transform_3(%arg0: i32) -> (i32, i32) {
    %c0_i32 = arith.constant 0 : i32
    %c0_i32_0 = arith.constant 0 : i32
    %c0_i32_1 = arith.constant 0 : i32
    return %c0_i32, %c0_i32_0 : i32, i32
  }
  func.func @transform_4(%arg0: i32) -> (i32, i32) {
    %c0_i32 = arith.constant 0 : i32
    %c0_i32_0 = arith.constant 0 : i32
    %c0_i32_1 = arith.constant 0 : i32
    return %c0_i32, %c0_i32_0 : i32, i32
  }
  func.func @transform_5(%arg0: i32) -> (i32, i32) {
    %c0_i32 = arith.constant 0 : i32
    %c0_i32_0 = arith.constant 0 : i32
    return %c0_i32, %arg0 : i32, i32
  }
}

</mosaic_0001>

<bundles_post_ra>
// kernel: tpu_custom_call.1
= control target key start
LH: loop header
LB: loop body
LE: loop exit
PB: predicated region body
PF: predicated region fallthrough
CT: control target
= control target key end

     0   :  { %s467_s0 = inlined_call_operand.hbm [shape: bf16[8,64], index: 0, kind: input, shape index: {}]   ;;  %s468_s1 = inlined_call_operand.hbm [shape: bf16[64,256], index: 1, kind: input, shape index: {}]   ;;  %s469_s2 = inlined_call_operand.vmem [shape: f32[1,256], index: 2, kind: input, shape index: {}]   ;;  %s470_s3 = inlined_call_operand.vmem [shape: f32[1,256], index: 3, kind: input, shape index: {}]   ;;  %s471_s4 = inlined_call_operand.<no memory space> [shape: f32[1,1], index: 4, kind: input, shape index: {}]   ;;  %s472_s5 = inlined_call_operand.hbm [shape: f32[1,8], index: 5, kind: output, shape index: {}]  }
   0x1   :  { %v10_v0 = vstv %s471_s4 }
   0x2   :  { %11 = vst [vmem:[#allocation2] sm:$0x1] %v10_v0 }
   0x3   :  { %12 = vsyncpa [#allocation4], 0 }
   0x4   :  { %13 = vsyncpa [#allocation7], 0 }
   0x5   :  { %14 = vsyncpa [#allocation5], 0  ;;  %s379_s20 = smov [#allocation3]   ;;  %s380_s22 = smov [#allocation6]  }
   0x6   :  { %s21_s21 = sshll.u32 %s379_s20, 4  ;;  %s30_s23 = sshll.u32 %s380_s22, 4  ;;  %s22_s21 = int_to_ptr.vmem [resolvable:$true] %s21_s21  ;;  %s418_s23 = int_to_ptr.vmem [resolvable:$true] %s30_s23 }
   0x7   :  { %s307_s26 = scalar_lea.hbm %s467_s0, 64 }
   0x8   :  { %p308_p0 = scmp.ne.s32.totalorder %s467_s0, %s307_s26  ;;  %p311_p1 = scmp.lt.u32.totalorder %s307_s26, %s467_s0 }
   0xa   :  { %p313_p2 = pnand %p311_p1, %p308_p0 }
   0xc   :  { %316 = shalt.err (!%p313_p2)
}
   0xd   :  { %s317_s30 = scalar_lea.vmem %s22_s21, 64  ;;  %p322_p4 = scmp.lt.s32.totalorder %s22_s21, %s22_s21 }
   0xe   :  { %p318_p3 = scmp.ne.s32.totalorder %s22_s21, %s317_s30  ;;  %p323_p5 = scmp.lt.s32.totalorder %s317_s30, %s317_s30 }
  0x10   :  { %p324_p6 = por %p323_p5, %p322_p4 }
  0x12   :  { %p325_p7 = pnand %p324_p6, %p318_p3 }
  0x14   :  { %328 = shalt.err (!%p325_p7)
}
  0x15   :  { %24 = dma.hbm_to_vmem [thread:$0]  %s467_s0, 64, %s22_s21, [#allocation4]  }
  0x16   :  { %s329_s10 = scalar_lea.hbm %s468_s1, 1024 }
  0x17   :  { %p330_p8 = scmp.ne.s32.totalorder %s468_s1, %s329_s10  ;;  %p333_p9 = scmp.lt.u32.totalorder %s329_s10, %s468_s1 }
  0x19   :  { %p335_p10 = pnand %p333_p9, %p330_p8 }
  0x1b   :  { %338 = shalt.err (!%p335_p10)
}
  0x1c   :  { %s339_s15 = scalar_lea.vmem %s418_s23, 1024  ;;  %p344_p12 = scmp.lt.s32.totalorder %s418_s23, %s418_s23 }
  0x1d   :  { %p340_p11 = scmp.ne.s32.totalorder %s418_s23, %s339_s15  ;;  %p345_p13 = scmp.lt.s32.totalorder %s339_s15, %s339_s15 }
  0x1f   :  { %p346_p0 = por %p345_p13, %p344_p12 }
  0x21   :  { %p347_p1 = pnand %p346_p0, %p340_p11 }
  0x23   :  { %350 = shalt.err (!%p347_p1)
}
  0x24   :  { %s381_s0 = smov 128   ;;  %s382_s16 = smov 8  }
  0x25   :  { %36 = dma.hbm_to_vmem [thread:$0]  %s468_s1, 1024, %s418_s23, [#allocation7], %s381_s0, %s381_s0, %s382_s16  }
  0x26   :  { %373 = dma.done.wait [#allocation4], 64  }
  0x27   :  { %374 = vsyncadd [#allocation4], 4294967232 }
  0x28   :  { %375 = dma.done.wait [#allocation7], 1024  }
  0x29   :  { %376 = vsyncadd [#allocation7], 4294966272  ;;  %v383_v1 = vmov 0   ;;  %v291_v2 = vld [vmem:[#allocation6 + $0x4] ss:$8 sps:$4 sm:$0xff]   ;;  %vm111_vm0 = vcmask 523264   ;;  %v61_v11 = vlaneseq }
  0x2a   :  { %147 = vmatprep.mubr.bf16.mxu0 %v383_v1  ;;  %290 = vset.pattern.permute.xlu0 %v383_v1  ;;  %v293_v3 = vld [vmem:[#allocation6] ss:$8 sps:$4 sm:$0xff]   ;;  %v294_v4 = vld [vmem:[#allocation6 + $0x14] ss:$8 sps:$4 sm:$0xff]   ;;  %v296_v5 = vld [vmem:[#allocation6 + $0x10] ss:$8 sps:$4 sm:$0xff]  }
  0x2b   :  { %115 = vmatprep.subr.bf16.mxu0 %v291_v2  ;;  %v297_v6 = vld [vmem:[#allocation6 + $0x24] ss:$8 sps:$4 sm:$0xff]   ;;  %v299_v7 = vld [vmem:[#allocation6 + $0x20] ss:$8 sps:$4 sm:$0xff]   ;;  %v300_v8 = vld [vmem:[#allocation6 + $0x34] ss:$8 sps:$4 sm:$0xff]  }
  0x2c   :  { %116 = vmatpush1.bf16.msra.mxu0 %v293_v3  ;;  %v302_v9 = vld [vmem:[#allocation6 + $0x30] ss:$8 sps:$4 sm:$0xff]   ;;  %v50_v10 = vld [vmem:[#allocation3] sm:$0xf]  ;;  %v62_v12 = vshrl.u32 %v61_v11, 7  ;;  %vm256_vm1 = vcmask 57344  }
  0x2d   :  { %117 = vmatprep.subr.bf16.mxu0 %v294_v4  ;;  %v158_v14 = vld [vmem:[%s470_s3] sm:$0x3] }
  0x2e   :  { %v67_v13 = vsub.s32 1, %v62_v12  ;;  %v159_v16 = vld [vmem:[#allocation2] sm:$0x1]  ;;  %v63_v17 = vsub.s32 0, %v62_v12 }
  0x2f   :  { %162 = vperm.xlu0 %290, %v159_v16   ;;  %v59_v18 = vld [vmem:[%s469_s2] sm:$0x3]  ;;  %s384_s2 = smov [#allocation8]  }
  0x30   :  { %118 = vmatpush1.bf16.msra.mxu0 %v296_v5  ;;  %v177_v15 = vrot.slane %v158_v14, %v67_v13  ;;  %v64_v19 = vrot.slane %v59_v18, %v63_v17  ;;  %v68_v20 = vrot.slane %v59_v18, %v67_v13  ;;  %v173_v29 = vrot.slane %v158_v14, %v63_v17  ;;  %s264_s3 = sshll.u32 %s384_s2, 4  ;;  %s265_s3 = int_to_ptr.vmem [resolvable:$true] %s264_s3 }
  0x31   :  { %119 = vmatprep.subr.bf16.mxu0 %v297_v6  ;;  %s351_s22 = scalar_lea.vmem %s265_s3, 16  ;;  %s355_s23 = scalar_lea.vmem %s265_s3, 32 }
  0x32   :  { %244 = vmatprep.mubr.f32.mxu1 %v177_v15  ;;  %p352_p2 = scmp.ne.s32.totalorder %s265_s3, %s351_s22  ;;  %p356_p3 = scmp.lt.s32.totalorder %s265_s3, %s265_s3 }
  0x33   :  { %p357_p4 = scmp.lt.s32.totalorder %s355_s23, %s351_s22 }
  0x34   :  { %120 = vmatpush1.bf16.msra.mxu0 %v299_v7 }
  0x35   :  { %121 = vmatprep.subr.bf16.mxu0 %v300_v8  ;;  %p358_p5 = por %p357_p4, %p356_p3 }
  0x37   :  { %p359_p6 = pnand %p358_p5, %p352_p2 }
  0x38   :  { %122 = vmatpush1.bf16.msra.mxu0 %v302_v9 }
  0x3b   :  { %282 = vmatmul.mubr.msk.bf16.vlgmr.msra.gmra.mrb[0].mxu0 %vm111_vm0, %v50_v10 }
  0xae   :  { %v163_v30 = vpop.permute.xlu0 %162 }
  0xaf   :  { %v168_v31 = vrot.slane %v163_v30, %v63_v17 }
 0x10e   :  { %v149_v21 = vpop.f32.mrb[0].mxu0 }
 0x10f   :  { %v150_v22 = vadd.f32 %v149_v21, %v64_v19  ;;  %v151_v23 = vpop.f32.mrb[1].mxu0 }
 0x110   :  { %v153_v24 = vpop.f32.mrb[2].mxu0  ;;  %v152_v25 = vadd.f32 %v151_v23, %v68_v20 }
 0x111   :  { %v154_v26 = vpop.f32.mrb[3].mxu0  ;;  %v156_v28 = vmax.f32 %v150_v22, 0.0 }
 0x112   :  { %v157_v27 = vmax.f32 %v152_v25, 0.0 }
 0x114   :  { %180 = vmatprep.subr.mxu1 %v157_v27 }
 0x115   :  { %181 = vmatpush1.xpose.msra.mxu1 %v156_v28 }
 0x118   :  { %245 = vmatmul.mubr.f32.vlgmr.msra.gmra.mrb[0].mxu1 %v173_v29 }
 0x1eb   :  { %v246_v32 = vpop.f32.mrb[0].mxu1 }
 0x1ec   :  { %v247_v33 = vadd.f32 %v246_v32, %v168_v31  ;;  %v248_v34 = vpop.f32.mrb[1].mxu1 }
 0x1ee   :  { %v283_v35 = vmul.f32 -1.442695, %v247_v33 }
 0x1f0   :  { %303 = vpow2.f32 %v283_v35 }
 0x1fa   :  { %v304_v36 = vpop.eup %303 }
 0x1fb   :  { %v253_v37 = vadd.f32 1.0, %v304_v36 }
 0x1fd   :  { %305 = vrcp.f32 %v253_v37 }
 0x207   :  { %v306_v38 = vpop.eup %305 }
 0x208   :  { %257 = vst.msk [vmem:[#allocation8] sm:$0x1] %vm256_vm1, %v306_v38 }
 0x209   :  { %362 = shalt.err (!%p359_p6)
}
 0x20a   :  { %s363_s26 = scalar_lea.hbm %s472_s5, 16 }
 0x20b   :  { %p364_p7 = scmp.ne.s32.totalorder %s472_s5, %s363_s26  ;;  %p367_p8 = scmp.lt.u32.totalorder %s363_s26, %s472_s5 }
 0x20d   :  { %p369_p9 = pnand %p367_p8, %p364_p7 }
 0x20f   :  { %372 = shalt.err (!%p369_p9)
}
 0x210   :  { %267 = dma.vmem_to_hbm [thread:$0]  %s265_s3, 16, %s472_s5, [#allocation5]  }
 0x211   :  { %377 = dma.done.wait [#allocation5], 16  }
 0x212   :  { %378 = vsyncadd [#allocation5], 4294967280 }
 0x213   :  { %271 = vsyncpa [#allocation4], 1 }
 0x214   :  { %272 = vsyncpa [#allocation7], 1 }
 0x215   :  { %273 = vsyncpa [#allocation5], 1 }

</bundles_post_ra>
